<compile_context>
chip_gen: v7x
topology: tpu7x:2x2x1
jax: 0.10.0
libtpu: 0.0.40
codegen_flags: <defaults>
</compile_context>

<pallas_src>
import functools
import math

import jax
import jax.numpy as jnp
from jax.experimental import pallas as pl
from jax.experimental.pallas import tpu as pltpu

LANES = 128
MAX_ROW_TILE = 2048          # 2048 * 128 * 4B = 1 MiB per f32 input block


def _int_pow(x, n):
    """x**n for a small non-negative Python int n via repeated multiplies."""
    result = None
    base = x
    while n > 0:
        if n & 1:
            result = base if result is None else result * base
        n >>= 1
        if n:
            base = base * base
    return result if result is not None else jnp.ones_like(x)


def _pow_const(x, e):
    """Strength-reduce x**e when e is an integer-valued Python constant."""
    e_f = float(e)
    if e_f == int(e_f) and 0 <= int(e_f) <= 16:
        return _int_pow(x, int(e_f))
    return jnp.power(x, jnp.float32(e_f))          # EUP fallback


def _gfl_kernel(pred_ref, tgt_ref, out_ref, acc_ref, *,
                alpha, gamma, rows_valid, row_tile, chunks_per_split,
                needs_mask):
    c = pl.program_id(0)
    i = pl.program_id(1)

    @pl.when(i == 0)
    def _():
        acc_ref[...] = jnp.zeros_like(acc_ref)

    eps = jnp.float32(1e-12)
    one = jnp.float32(1.0)
    p = pred_ref[...].astype(jnp.float32)
    t = tgt_ref[...].astype(jnp.float32)

    pos_w = (t == one).astype(jnp.float32)
    neg_w = _pow_const(one - t, gamma)
    pos_loss = -jnp.log(p + eps) * _pow_const(one - p, alpha) * pos_w
    neg_loss = -jnp.log(one - p + eps) * _pow_const(p, alpha) * neg_w
    loss = pos_loss + neg_loss

    if needs_mask:
        # Zero out rows beyond the logical end of the array (ragged last tile
        # and clamped/duplicated out-of-range chunks on the split axis).
        logical_chunk = c * chunks_per_split + i
        row0 = logical_chunk * row_tile
        local_row = jax.lax.broadcasted_iota(jnp.int32, loss.shape, 0)
        mask = (row0 + local_row) < rows_valid
        loss = jnp.where(mask, loss, jnp.float32(0.0))

    acc_ref[...] += loss

    @pl.when(i == pl.num_programs(1) - 1)
    def _():
        partial = acc_ref[...].reshape(row_tile // 8, 8, LANES)
        out_ref[...] = jnp.sum(partial, axis=0)[None, :, :]


def gaussian_focal_loss_sum_pallas(pred, target, alpha=2.0, gamma=4.0):
    """Returns sum over all elements of gaussian_focal_loss(pred, target)."""
    assert pred.shape == target.shape
    n = math.prod(pred.shape) if pred.shape else 1
    if n == 0:
        return jnp.float32(0.0)

    # Keep the input dtype across the DMA (bf16 inputs stream at half the
    # bytes); the upcast to f32 happens inside the kernel.
    pred_f = pred.reshape(-1)
    tgt_f = target.reshape(-1)

    # Pad only to a lane multiple (needed for the (rows, 128) reshape).
    # Zero padding (pred=0, target=0) contributes exactly 0 to the loss.
    pad = (-n) % LANES
    if pad:
        pred_f = jnp.pad(pred_f, (0, pad))
        tgt_f = jnp.pad(tgt_f, (0, pad))

    rows = (n + pad) // LANES
    pred2d = pred_f.reshape(rows, LANES)
    tgt2d = tgt_f.reshape(rows, LANES)

    def _round_up(v, m):
        return ((v + m - 1) // m) * m

    row_tile = min(MAX_ROW_TILE, _round_up(rows, 16))
    total_chunks = pl.cdiv(rows, row_tile)
    # v7x has 2 TensorCores; split the reduction across them when there is
    # enough work.  No-op on v5e/v6e (single TC runs both halves serially).
    num_splits = 2 if total_chunks >= 2 else 1
    cpc = pl.cdiv(total_chunks, num_splits)
    max_chunk = total_chunks - 1
    needs_mask = (total_chunks * row_tile != rows) or (cpc * num_splits != total_chunks)

    def in_idx(c, i):
        # Clamp so no block index ever points past the array; the kernel
        # masks the duplicated chunk's contribution to zero.
        return (jnp.minimum(c * cpc + i, max_chunk), 0)

    kernel = functools.partial(
        _gfl_kernel, alpha=alpha, gamma=gamma, rows_valid=rows,
        row_tile=row_tile, chunks_per_split=cpc, needs_mask=needs_mask)

    partials = pl.pallas_call(
        kernel,
        out_shape=jax.ShapeDtypeStruct((num_splits, 8, LANES), jnp.float32),
        grid_spec=pltpu.PrefetchScalarGridSpec(
            num_scalar_prefetch=0,
            grid=(num_splits, cpc),
            in_specs=[
                pl.BlockSpec((row_tile, LANES), in_idx),
                pl.BlockSpec((row_tile, LANES), in_idx),
            ],
            out_specs=pl.BlockSpec((1, 8, LANES), lambda c, i: (c, 0, 0)),
            scratch_shapes=[pltpu.VMEM((row_tile, LANES), jnp.float32)],
        ),
        compiler_params=pltpu.CompilerParams(
            dimension_semantics=("parallel", "arbitrary")),
    )(pred2d, tgt2d)
    return jnp.sum(partials)


class GaussianFocalLossPallas:
    """JAX/Pallas equivalent of the PyTorch GaussianFocalLoss module."""

    def __init__(self, alpha=2.0, gamma=4.0, reduction='mean',
                 loss_weight=1.0):
        self.alpha = alpha
        self.gamma = gamma
        self.reduction = reduction
        self.loss_weight = loss_weight

    def __call__(self, pred, target, weight=None, avg_factor=None,
                 reduction_override=None):
        assert reduction_override in (None, 'none', 'mean', 'sum')
        # NOTE: faithful to the PyTorch forward: `weight` and the configured
        # reduction are ignored and the module always does loss.sum()/avg_factor.
        # TODO(synk): like the original, avg_factor=None is not supported.
        loss_sum = gaussian_focal_loss_sum_pallas(
            pred, target, alpha=self.alpha, gamma=self.gamma)
        return self.loss_weight * loss_sum / avg_factor


def _reference_loss_sum(pred, target, alpha, gamma):
    eps = 1e-12
    pred = pred.astype(jnp.float32)
    target = target.astype(jnp.float32)
    pos_w = (target == 1.0).astype(jnp.float32)
    neg_w = jnp.power(1.0 - target, gamma)
    pos_loss = -jnp.log(pred + eps) * jnp.power(1.0 - pred, alpha) * pos_w
    neg_loss = -jnp.log(1.0 - pred + eps) * jnp.power(pred, alpha) * neg_w
    return jnp.sum(pos_loss + neg_loss)


if __name__ == "__main__":
    key = jax.random.PRNGKey(0)

    def make_inputs(k, shape, peaks):
        k1, k2 = jax.random.split(k)
        pred = jax.nn.sigmoid(jax.random.normal(k1, shape, dtype=jnp.float32))
        target = jax.random.uniform(k2, shape, dtype=jnp.float32,
                                    minval=0.0, maxval=0.99)
        for idx in peaks:
            target = target.at[idx].set(1.0)
        return pred, target

    k0, k1, k2 = jax.random.split(key, 3)

    # Primary check: NCHW heatmaps, module forward vs reference.
    pred, target = make_inputs(
        k0, (2, 4, 16, 16), [(0, 0, 4, 4), (1, 2, 8, 9), (1, 3, 12, 3)])
    num_pos = jnp.sum((target == 1.0).astype(jnp.float32))
    avg_factor = jnp.maximum(num_pos, 1.0)
    loss_mod = GaussianFocalLossPallas(alpha=2.0, gamma=4.0,
                                       reduction='mean', loss_weight=1.0)
    loss = jax.block_until_ready(loss_mod(pred, target, avg_factor=avg_factor))
    ref = _reference_loss_sum(pred, target, 2.0, 4.0) / avg_factor
    assert jnp.allclose(loss, ref, rtol=1e-4, atol=1e-6), (loss, ref)

    # Ragged check: element count not a multiple of 128 -> lane pad + row mask.
    pred2, target2 = make_inputs(k1, (2, 3, 13, 17), [(0, 1, 5, 5)])
    s2 = jax.block_until_ready(gaussian_focal_loss_sum_pallas(pred2, target2))
    ref2 = _reference_loss_sum(pred2, target2, 2.0, 4.0)
    assert jnp.allclose(s2, ref2, rtol=1e-4, atol=1e-6), (s2, ref2)

    # Multi-chunk check: exercises the 2-way split, clamped out-of-range
    # chunk and the partial last tile.
    pred3, target3 = make_inputs(k2, (1, 1, 4196, 128), [(0, 0, 100, 7)])
    s3 = jax.block_until_ready(gaussian_focal_loss_sum_pallas(pred3, target3))
    ref3 = _reference_loss_sum(pred3, target3, 2.0, 4.0)
    assert jnp.allclose(s3, ref3, rtol=1e-4, atol=1e-6), (s3, ref3)

    print("KERNEL_OK")
</pallas_src>

<mosaic_0001>
module attributes {stable_mosaic.version = 11 : i64} {
  func.func @_gfl_kernel(%arg0: i32, %arg1: i32, %arg2: memref<16x128xf32, #tpu.memory_space<vmem>>, %arg3: memref<16x128xf32, #tpu.memory_space<vmem>>, %arg4: memref<1x8x128xf32, #tpu.memory_space<vmem>>, %arg5: memref<16x128xf32, #tpu.memory_space<vmem>>) attributes {dimension_semantics = [#tpu.dimension_semantics<parallel>, #tpu.dimension_semantics<arbitrary>], iteration_bounds = array<i64: 1, 1>, scalar_prefetch = 0 : i64, scratch_operands = 1 : i64, tpu.core_type = #tpu.core_type<tc>, window_params = [{transform_indices = @transform_0, window_bounds = array<i64: 16, 128>}, {transform_indices = @transform_1, window_bounds = array<i64: 16, 128>}, {transform_indices = @transform_2, window_bounds = array<i64: 1, 8, 128>}]} {
    %c0_i32 = arith.constant 0 : i32
    %0 = arith.cmpi eq, %arg1, %c0_i32 : i32
    %1 = arith.extui %0 : i1 to i32
    %c0_i32_0 = arith.constant 0 : i32
    %2 = arith.cmpi ne, %1, %c0_i32_0 : i32
    scf.if %2 {
      %cst_17 = arith.constant 0.000000e+00 : f32
      %40 = vector.broadcast %cst_17 : f32 to vector<16x128xf32>
      %c0_18 = arith.constant 0 : index
      %c0_19 = arith.constant 0 : index
      %41 = vector.load %arg5[%c0_18, %c0_19] : memref<16x128xf32, #tpu.memory_space<vmem>>, vector<16x128xf32>
      tpu.vector_store %arg5[%c0_18, %c0_19], %40 {strides = array<i32>} : memref<16x128xf32, #tpu.memory_space<vmem>>, vector<16x128xf32>,
    } else {
    }
    %c0 = arith.constant 0 : index
    %c0_1 = arith.constant 0 : index
    %3 = vector.load %arg2[%c0, %c0_1] : memref<16x128xf32, #tpu.memory_space<vmem>>, vector<16x128xf32>
    %c0_2 = arith.constant 0 : index
    %c0_3 = arith.constant 0 : index
    %4 = vector.load %arg3[%c0_2, %c0_3] : memref<16x128xf32, #tpu.memory_space<vmem>>, vector<16x128xf32>
    %cst = arith.constant 1.000000e+00 : f32
    %5 = vector.broadcast %cst : f32 to vector<16x128xf32>
    %6 = arith.cmpf oeq, %4, %5 : vector<16x128xf32>
    %7 = arith.extui %6 : vector<16x128xi1> to vector<16x128xi32>
    %8 = arith.sitofp %7 : vector<16x128xi32> to vector<16x128xf32>
    %cst_4 = arith.constant 1.000000e+00 : f32
    %9 = vector.broadcast %cst_4 : f32 to vector<16x128xf32>
    %10 = arith.subf %9, %4 : vector<16x128xf32>
    %11 = arith.mulf %10, %10 : vector<16x128xf32>
    %12 = arith.mulf %11, %11 : vector<16x128xf32>
    %cst_5 = arith.constant 9.99999996E-13 : f32
    %13 = vector.broadcast %cst_5 : f32 to vector<16x128xf32>
    %14 = arith.addf %3, %13 : vector<16x128xf32>
    %15 = math.log %14 : vector<16x128xf32>
    %cst_6 = arith.constant 0.000000e+00 : f32
    %16 = vector.broadcast %cst_6 : f32 to vector<16x128xf32>
    %17 = arith.subf %16, %15 : vector<16x128xf32>
    %cst_7 = arith.constant 1.000000e+00 : f32
    %18 = vector.broadcast %cst_7 : f32 to vector<16x128xf32>
    %19 = arith.subf %18, %3 : vector<16x128xf32>
    %20 = arith.mulf %19, %19 : vector<16x128xf32>
    %21 = arith.mulf %17, %20 : vector<16x128xf32>
    %22 = arith.mulf %21, %8 : vector<16x128xf32>
    %cst_8 = arith.constant 1.000000e+00 : f32
    %23 = vector.broadcast %cst_8 : f32 to vector<16x128xf32>
    %24 = arith.subf %23, %3 : vector<16x128xf32>
    %cst_9 = arith.constant 9.99999996E-13 : f32
    %25 = vector.broadcast %cst_9 : f32 to vector<16x128xf32>
    %26 = arith.addf %24, %25 : vector<16x128xf32>
    %27 = math.log %26 : vector<16x128xf32>
    %cst_10 = arith.constant 0.000000e+00 : f32
    %28 = vector.broadcast %cst_10 : f32 to vector<16x128xf32>
    %29 = arith.subf %28, %27 : vector<16x128xf32>
    %30 = arith.mulf %3, %3 : vector<16x128xf32>
    %31 = arith.mulf %29, %30 : vector<16x128xf32>
    %32 = arith.mulf %31, %12 : vector<16x128xf32>
    %33 = arith.addf %22, %32 : vector<16x128xf32>
    %c0_11 = arith.constant 0 : index
    %c0_12 = arith.constant 0 : index
    %34 = vector.load %arg5[%c0_11, %c0_12] : memref<16x128xf32, #tpu.memory_space<vmem>>, vector<16x128xf32>
    %35 = arith.addf %34, %33 : vector<16x128xf32>
    %c0_13 = arith.constant 0 : index
    %c0_14 = arith.constant 0 : index
    %36 = vector.load %arg5[%c0_13, %c0_14] : memref<16x128xf32, #tpu.memory_space<vmem>>, vector<16x128xf32>
    tpu.vector_store %arg5[%c0_13, %c0_14], %35 {strides = array<i32>} : memref<16x128xf32, #tpu.memory_space<vmem>>, vector<16x128xf32>,
    %c0_i32_15 = arith.constant 0 : i32
    %37 = arith.cmpi eq, %arg1, %c0_i32_15 : i32
    %38 = arith.extui %37 : i1 to i32
    %c0_i32_16 = arith.constant 0 : i32
    %39 = arith.cmpi ne, %38, %c0_i32_16 : i32
    scf.if %39 {
      %c0_17 = arith.constant 0 : index
      %c0_18 = arith.constant 0 : index
      %40 = vector.load %arg5[%c0_17, %c0_18] : memref<16x128xf32, #tpu.memory_space<vmem>>, vector<16x128xf32>
      %41 = vector.shape_cast %40 : vector<16x128xf32> to vector<2x8x128xf32>
      %cst_19 = arith.constant dense<0.000000e+00> : vector<8x128xf32>
      %42 = vector.multi_reduction <add>, %41, %cst_19 [0] : vector<2x8x128xf32> to vector<8x128xf32>
      %43 = vector.shape_cast %42 : vector<8x128xf32> to vector<1x8x128xf32>
      %c0_20 = arith.constant 0 : index
      %c0_21 = arith.constant 0 : index
      %c0_22 = arith.constant 0 : index
      %44 = vector.load %arg4[%c0_20, %c0_21, %c0_22] : memref<1x8x128xf32, #tpu.memory_space<vmem>>, vector<1x8x128xf32>
      tpu.vector_store %arg4[%c0_20, %c0_21, %c0_22], %43 {strides = array<i32>} : memref<1x8x128xf32, #tpu.memory_space<vmem>>, vector<1x8x128xf32>,
    } else {
    }
    return
  }
  func.func @transform_0(%arg0: i32, %arg1: i32) -> (i32, i32) {
    %c1_i32 = arith.constant 1 : i32
    %0 = arith.muli %arg0, %c1_i32 : i32
    %1 = arith.addi %0, %arg1 : i32
    %c0_i32 = arith.constant 0 : i32
    %2 = arith.minsi %1, %c0_i32 : i32
    %c0_i32_0 = arith.constant 0 : i32
    %c0_i32_1 = arith.constant 0 : i32
    return %2, %c0_i32_0 : i32, i32
  }
  func.func @transform_1(%arg0: i32, %arg1: i32) -> (i32, i32) {
    %c1_i32 = arith.constant 1 : i32
    %0 = arith.muli %arg0, %c1_i32 : i32
    %1 = arith.addi %0, %arg1 : i32
    %c0_i32 = arith.constant 0 : i32
    %2 = arith.minsi %1, %c0_i32 : i32
    %c0_i32_0 = arith.constant 0 : i32
    %c0_i32_1 = arith.constant 0 : i32
    return %2, %c0_i32_0 : i32, i32
  }
  func.func @transform_2(%arg0: i32, %arg1: i32) -> (i32, i32, i32) {
    %c0_i32 = arith.constant 0 : i32
    %c0_i32_0 = arith.constant 0 : i32
    %c0_i32_1 = arith.constant 0 : i32
    return %arg0, %c0_i32, %c0_i32_0 : i32, i32, i32
  }
}

</mosaic_0001>

<bundles_post_ra>
// kernel: tpu_custom_call.1
= control target key start
LH: loop header
LB: loop body
LE: loop exit
PB: predicated region body
PF: predicated region fallthrough
CT: control target
= control target key end

     0   :  { %7 = vsyncpa [#allocation4], 0  ;;  %s292_s0 = inlined_call_operand.hbm [shape: f32[16,128], index: 0, kind: input, shape index: {}]   ;;  %s293_s1 = inlined_call_operand.hbm [shape: f32[16,128], index: 1, kind: input, shape index: {}]   ;;  %s294_s2 = inlined_call_operand.hbm [shape: f32[1,8,128], index: 2, kind: output, shape index: {}]  }
   0x1   :  { %8 = vsyncpa [#allocation7], 0 }
   0x2   :  { %9 = vsyncpa [#allocation5], 0  ;;  %s235_s9 = smov [#allocation3]   ;;  %s163_s13 = scalar_lea.hbm %s292_s0, 256 }
   0x3   :  { %s21_s10 = sshll.u32 %s235_s9, 4  ;;  %p164_p0 = scmp.ne.s32.totalorder %s292_s0, %s163_s13  ;;  %s22_s10 = int_to_ptr.vmem [resolvable:$true] %s21_s10 }
   0x4   :  { %p167_p1 = scmp.lt.u32.totalorder %s163_s13, %s292_s0 }
   0x6   :  { %p169_p2 = pnand %p167_p1, %p164_p0 }
   0x8   :  { %172 = shalt.err (!%p169_p2)
}
   0x9   :  { %s173_s18 = scalar_lea.vmem %s22_s10, 256  ;;  %p178_p4 = scmp.lt.s32.totalorder %s22_s10, %s22_s10 }
   0xa   :  { %p174_p3 = scmp.ne.s32.totalorder %s22_s10, %s173_s18  ;;  %p179_p5 = scmp.lt.s32.totalorder %s173_s18, %s173_s18 }
   0xc   :  { %p180_p6 = por %p179_p5, %p178_p4 }
   0xe   :  { %p181_p7 = pnand %p180_p6, %p174_p3 }
  0x10   :  { %184 = shalt.err (!%p181_p7)
}
  0x11   :  { %s236_s19 = smov 128   ;;  %s237_s20 = smov 8  }
  0x12   :  { %27 = dma.hbm_to_vmem [thread:$0]  %s292_s0, 256, %s22_s10, [#allocation4], %s236_s19, %s236_s19, %s237_s20  }
  0x13   :  { %s238_s23 = smov [#allocation6]   ;;  %s185_s27 = scalar_lea.hbm %s293_s1, 256 }
  0x14   :  { %s39_s24 = sshll.u32 %s238_s23, 4  ;;  %p186_p8 = scmp.ne.s32.totalorder %s293_s1, %s185_s27  ;;  %s40_s24 = int_to_ptr.vmem [resolvable:$true] %s39_s24 }
  0x15   :  { %p189_p9 = scmp.lt.u32.totalorder %s185_s27, %s293_s1 }
  0x17   :  { %p191_p10 = pnand %p189_p9, %p186_p8 }
  0x19   :  { %194 = shalt.err (!%p191_p10)
}
  0x1a   :  { %s195_s4 = scalar_lea.vmem %s40_s24, 256  ;;  %p200_p12 = scmp.lt.s32.totalorder %s40_s24, %s40_s24 }
  0x1b   :  { %p196_p11 = scmp.ne.s32.totalorder %s40_s24, %s195_s4  ;;  %p201_p13 = scmp.lt.s32.totalorder %s195_s4, %s195_s4 }
  0x1d   :  { %p202_p0 = por %p201_p13, %p200_p12 }
  0x1f   :  { %p203_p1 = pnand %p202_p0, %p196_p11 }
  0x21   :  { %206 = shalt.err (!%p203_p1)
}
  0x22   :  { %45 = dma.hbm_to_vmem [thread:$0]  %s293_s1, 256, %s40_s24, [#allocation7], %s236_s19, %s236_s19, %s237_s20  }
  0x23   :  { %229 = dma.done.wait [#allocation4], 256  }
  0x24   :  { %230 = vsyncadd [#allocation4], 4294967040 }
  0x25   :  { %231 = dma.done.wait [#allocation7], 256  }
  0x26   :  { %232 = vsyncadd [#allocation7], 4294967040  ;;  %v66_v0 = vld [vmem:[#allocation3] sm:$0xff]  ;;  %v67_v1 = vld [vmem:[#allocation3 + $0x8] sm:$0xff]  ;;  %v239_v26 = vmov 0.0   ;;  %s240_s1 = smov [#allocation8]  }
  0x27   :  { %v82_v2 = vadd.f32 1e-12, %v66_v0  ;;  %v90_v3 = vsub.f32 1.0, %v66_v0  ;;  %v83_v4 = vadd.f32 1e-12, %v67_v1  ;;  %v91_v5 = vsub.f32 1.0, %v67_v1 }
  0x28   :  { %v68_v8 = vld [vmem:[#allocation6] sm:$0xff]  ;;  %v69_v9 = vld [vmem:[#allocation6 + $0x8] sm:$0xff]  ;;  %v106_v25 = vmul.f32 %v66_v0, %v66_v0  ;;  %v107_v30 = vmul.f32 %v67_v1, %v67_v1  ;;  %s133_s6 = sshll.u32 %s240_s1, 4  ;;  %s134_s6 = int_to_ptr.vmem [resolvable:$true] %s133_s6 }
  0x29   :  { %155 = vlog2.f32 %v82_v2  ;;  %v98_v6 = vadd.f32 1e-12, %v90_v3  ;;  %v99_v7 = vadd.f32 1e-12, %v91_v5  ;;  %v76_v10 = vsub.f32 1.0, %v68_v8  ;;  %s207_s7 = scalar_lea.vmem %s134_s6, 128  ;;  %p212_p3 = scmp.lt.s32.totalorder %s134_s6, %s134_s6 }
  0x2a   :  { %157 = vlog2.f32 %v83_v4  ;;  %v77_v11 = vsub.f32 1.0, %v69_v9  ;;  %v92_v15 = vmul.f32 %v90_v3, %v90_v3  ;;  %vm70_vm0 = vcmp.eq.f32.partialorder %v68_v8, 1.0  ;;  %p208_p2 = scmp.ne.s32.totalorder %s134_s6, %s207_s7  ;;  %p213_p4 = scmp.lt.s32.totalorder %s207_s7, %s207_s7 }
  0x2b   :  { %159 = vlog2.f32 %v98_v6  ;;  %v78_v16 = vmul.f32 %v76_v10, %v76_v10  ;;  %v93_v18 = vmul.f32 %v91_v5, %v91_v5  ;;  %vm71_vm1 = vcmp.eq.f32.partialorder %v69_v9, 1.0 }
  0x2c   :  { %161 = vlog2.f32 %v99_v7  ;;  %v79_v20 = vmul.f32 %v77_v11, %v77_v11  ;;  %v147_v27 = vsel %vm70_vm0, 1.0, %v239_v26  ;;  %v148_v31 = vsel %vm71_vm1, 1.0, %v239_v26  ;;  %p214_p5 = por %p213_p4, %p212_p3 }
  0x2d   :  { %v80_v32 = vmul.f32 %v78_v16, %v78_v16 }
  0x2e   :  { %v81_v35 = vmul.f32 %v79_v20, %v79_v20  ;;  %p215_p6 = pnand %p214_p5, %p208_p2 }
  0x33   :  { %v156_v12 = vpop.eup %155 }
  0x34   :  { %v158_v13 = vpop.eup %157  ;;  %v85_v14 = vmul.f32 0.6931472, %v156_v12 }
  0x35   :  { %v87_v17 = vmul.f32 0.6931472, %v158_v13  ;;  %v160_v19 = vpop.eup %159 }
  0x36   :  { %v88_v21 = vsub.f32 0.0, %v85_v14  ;;  %v162_v22 = vpop.eup %161  ;;  %v101_v24 = vmul.f32 0.6931472, %v160_v19 }
  0x37   :  { %v89_v23 = vsub.f32 0.0, %v87_v17  ;;  %v103_v29 = vmul.f32 0.6931472, %v162_v22 }
  0x38   :  { %v94_v28 = vmul.f32 %v92_v15, %v88_v21  ;;  %v104_v34 = vsub.f32 0.0, %v101_v24 }
  0x39   :  { %v95_v33 = vmul.f32 %v93_v18, %v89_v23  ;;  %v105_v36 = vsub.f32 0.0, %v103_v29 }
  0x3a   :  { %v96_v37 = vmul.f32 %v147_v27, %v94_v28  ;;  %v108_v38 = vmul.f32 %v106_v25, %v104_v34 }
  0x3b   :  { %v97_v39 = vmul.f32 %v148_v31, %v95_v33  ;;  %v109_v40 = vmul.f32 %v107_v30, %v105_v36 }
  0x3c   :  { %v110_v41 = vmul.f32 %v108_v38, %v80_v32 }
  0x3d   :  { %v111_v42 = vmul.f32 %v109_v40, %v81_v35 }
  0x3e   :  { %v112_v43 = vadd.f32 %v110_v41, %v96_v37 }
  0x3f   :  { %v113_v44 = vadd.f32 %v111_v42, %v97_v39 }
  0x41   :  { %v125_v45 = vadd.f32 %v113_v44, %v112_v43 }
  0x43   :  { %126 = vst [vmem:[#allocation8] sm:$0xff] %v125_v45 }
  0x44   :  { %218 = shalt.err (!%p215_p6)
}
  0x45   :  { %s219_s10 = scalar_lea.hbm %s294_s2, 128 }
  0x46   :  { %p220_p7 = scmp.ne.s32.totalorder %s294_s2, %s219_s10  ;;  %p223_p8 = scmp.lt.u32.totalorder %s219_s10, %s294_s2 }
  0x48   :  { %p225_p9 = pnand %p223_p8, %p220_p7 }
  0x4a   :  { %228 = shalt.err (!%p225_p9)
}
  0x4b   :  { %136 = dma.vmem_to_hbm [thread:$0]  %s134_s6, 128, %s294_s2, [#allocation5]  }
  0x4c   :  { %233 = dma.done.wait [#allocation5], 128  }
  0x4d   :  { %234 = vsyncadd [#allocation5], 4294967168 }
  0x4e   :  { %140 = vsyncpa [#allocation4], 1 }
  0x4f   :  { %141 = vsyncpa [#allocation7], 1 }
  0x50   :  { %142 = vsyncpa [#allocation5], 1 }

</bundles_post_ra>
